<compile_context>
chip_gen: v7x
topology: tpu7x:2x2x1
jax: 0.10.0
libtpu: 0.0.40
codegen_flags: <defaults>
</compile_context>

<pallas_src>
import functools
import math

import jax
import jax.numpy as jnp
from jax.experimental import pallas as pl
from jax.experimental.pallas import tpu as pltpu


def _round_up(x, m):
    return (x + m - 1) // m * m


def _vmem_budget_bytes():
    cap = 64 * 1024 * 1024  # conservative fallback (v7x physical VMEM)
    try:
        info = pltpu.get_tpu_info()
        cap = int(getattr(info, "vmem_capacity_bytes", cap))
    except Exception:
        pass
    return (cap * 7) // 10  # leave headroom for compiler scratch


def _pick_tiles(b, c, d, in_bytes, budget):
    """Tile sizes satisfying the (8, 128) layout rule and the VMEM budget."""
    tb = min(256, _round_up(b, 8))
    tc = c if c <= 512 else 512  # full dim (always legal) or 128-multiple

    def footprint(tb_, tc_):
        return (
            2 * (tb_ * d + tc_ * d) * in_bytes  # double-buffered x and W tiles
            + 2 * tb_ * tc_ * 4                 # double-buffered cosine out tile
            + 2 * tb_ * 128 * 4                 # label in + per-example-loss out
            + 4 * tb_ * 128 * 4                 # scratch (m, l, t, 1/||x||)
        )

    while footprint(tb, tc) > budget and tc >= 256 and tc % 256 == 0:
        tc //= 2
    while footprint(tb, tc) > budget and tb > 8:
        tb = max(8, tb // 2)
    return tb, tc


def _linear_loss_kernel(
    x_ref,      # (tb, d)   input dtype, resident across the C sweep
    w_ref,      # (tc, d)   input dtype, streamed
    lbl_ref,    # (tb, 1)   int32, resident across the C sweep
    loss_ref,   # (tb, 1)   f32 per-example loss (written on last C step)
    cos_ref,    # (tb, tc)  cosine output tile
    m_sc,       # (tb, 1)   f32 running max
    l_sc,       # (tb, 1)   f32 running sum of exp
    t_sc,       # (tb, 1)   f32 running target logit
    invx_sc,    # (tb, 1)   f32 cached 1/||x|| per row
    *,
    b_true,
    c_true,
    b_pad,
    c_pad,
    tb,
    tc,
    compute_dtype,
):
    i = pl.program_id(0)
    j = pl.program_id(1)
    nc = pl.num_programs(1)

    @pl.when(j == 0)
    def _init():
        m_sc[...] = jnp.full_like(m_sc, -jnp.inf)
        l_sc[...] = jnp.zeros_like(l_sc)
        t_sc[...] = jnp.zeros_like(t_sc)
        xf = x_ref[...].astype(jnp.float32)
        # F.normalize eps=1e-12 on the norm == rsqrt(max(sumsq, 1e-24))
        x_sumsq = jnp.sum(xf * xf, axis=-1, keepdims=True)
        invx_sc[...] = jax.lax.rsqrt(jnp.maximum(x_sumsq, 1e-24))

    # Normalize the W rows with rsqrt + multiply (natural (tc,1) broadcast).
    wf = w_ref[...].astype(jnp.float32)
    w_sumsq = jnp.sum(wf * wf, axis=-1, keepdims=True)
    inv_w = jax.lax.rsqrt(jnp.maximum(w_sumsq, 1e-24))
    wn = (wf * inv_w).astype(compute_dtype)                      # (tc, d)

    # MXU matmul contracting the last dims of both operands (W stays (C, D)),
    # f32 accumulation; 1/||x|| applied to the f32 result afterwards.
    raw = jax.lax.dot_general(
        x_ref[...].astype(compute_dtype),
        wn,
        dimension_numbers=(((1,), (1,)), ((), ())),
        preferred_element_type=jnp.float32,
    )                                                            # (tb, tc) f32
    cosine = raw * invx_sc[...]                                  # (tb, tc) f32
    cos_ref[...] = cosine.astype(cos_ref.dtype)

    # ---- streaming logsumexp + target-logit gather -------------------------
    col_ids = j * tc + jax.lax.broadcasted_iota(jnp.int32, (tb, tc), 1)

    logits = cosine
    if c_pad != c_true:  # static: mask padded classes out of the softmax
        logits = jnp.where(col_ids < c_true, logits, -jnp.inf)

    m_prev = m_sc[...]
    m_new = jnp.maximum(m_prev, jnp.max(logits, axis=-1, keepdims=True))
    alpha = jnp.exp(m_prev - m_new)                              # 0 on first step
    p = jnp.exp(logits - m_new)
    l_sc[...] = alpha * l_sc[...] + jnp.sum(p, axis=-1, keepdims=True)
    m_sc[...] = m_new

    onehot = (col_ids == lbl_ref[...]).astype(jnp.float32)       # (tb, tc)
    t_sc[...] = t_sc[...] + jnp.sum(onehot * cosine, axis=-1, keepdims=True)

    @pl.when(j == nc - 1)
    def _finalize():
        lse = m_sc[...] + jnp.log(l_sc[...])
        per_ex = lse - t_sc[...]                                 # (tb, 1)
        if b_pad != b_true:  # static: zero padded rows before the mean
            row_ids = i * tb + jax.lax.broadcasted_iota(jnp.int32, (tb, 1), 0)
            per_ex = jnp.where(row_ids < b_true, per_ex, 0.0)
        loss_ref[...] = per_ex


def linear_loss(x, weight, label, *, compute_dtype=jnp.bfloat16):
    """x: (B, in_features), weight: (out_features, in_features), label: (B,) int.
    Returns (mean cross-entropy loss scalar f32, cosine (B, out_features))."""
    b, d = x.shape
    c, d2 = weight.shape
    assert d == d2, "feature dims must match"

    budget = _vmem_budget_bytes()
    tb, tc = _pick_tiles(b, c, d, x.dtype.itemsize, budget)
    b_pad = _round_up(b, tb)
    c_pad = _round_up(c, tc)
    nb, ncb = b_pad // tb, c_pad // tc

    x_p = jnp.pad(x, ((0, b_pad - b), (0, 0)))
    w_p = jnp.pad(weight, ((0, c_pad - c), (0, 0)))
    lbl_p = jnp.pad(label.astype(jnp.int32), (0, b_pad - b)).reshape(b_pad, 1)

    kernel = functools.partial(
        _linear_loss_kernel,
        b_true=b, c_true=c, b_pad=b_pad, c_pad=c_pad,
        tb=tb, tc=tc, compute_dtype=compute_dtype,
    )

    per_ex, cosine = pl.pallas_call(
        kernel,
        out_shape=(
            jax.ShapeDtypeStruct((b_pad, 1), jnp.float32),
            jax.ShapeDtypeStruct((b_pad, c_pad), x.dtype),
        ),
        grid_spec=pltpu.PrefetchScalarGridSpec(
            num_scalar_prefetch=0,
            grid=(nb, ncb),
            in_specs=[
                pl.BlockSpec((tb, d), lambda i, j: (i, 0)),   # x: resident per B tile
                pl.BlockSpec((tc, d), lambda i, j: (j, 0)),   # W: streamed over C
                pl.BlockSpec((tb, 1), lambda i, j: (i, 0)),   # labels: per B tile
            ],
            out_specs=(
                pl.BlockSpec((tb, 1), lambda i, j: (i, 0)),   # per-example loss
                pl.BlockSpec((tb, tc), lambda i, j: (i, j)),  # cosine tile
            ),
            scratch_shapes=[
                pltpu.VMEM((tb, 1), jnp.float32),  # running max
                pltpu.VMEM((tb, 1), jnp.float32),  # running sum
                pltpu.VMEM((tb, 1), jnp.float32),  # running target logit
                pltpu.VMEM((tb, 1), jnp.float32),  # cached 1/||x||
            ],
        ),
        compiler_params=pltpu.CompilerParams(
            dimension_semantics=("parallel", "arbitrary"),
            vmem_limit_bytes=int(budget),
        ),
    )(x_p, w_p, lbl_p)

    loss = jnp.sum(per_ex) / b          # padded rows already zeroed in-kernel
    return loss, cosine[:b, :c]


def _reference(x, weight, label):
    xn = x / jnp.maximum(jnp.linalg.norm(x, axis=-1, keepdims=True), 1e-12)
    wn = weight / jnp.maximum(jnp.linalg.norm(weight, axis=-1, keepdims=True), 1e-12)
    cosine = xn @ wn.T
    lse = jax.nn.logsumexp(cosine, axis=-1)
    tgt = jnp.take_along_axis(cosine, label[:, None], axis=-1)[:, 0]
    return jnp.mean(lse - tgt), cosine


if __name__ == "__main__":
    B, in_features, out_features = 8, 32, 16

    key = jax.random.PRNGKey(0)
    kx, kw, kl = jax.random.split(key, 3)

    x = jax.random.normal(kx, (B, in_features), dtype=jnp.float32)
    label = jax.random.randint(kl, (B,), 0, out_features, dtype=jnp.int32)

    # nn.init.xavier_uniform_ on weight of shape (out_features, in_features)
    bound = math.sqrt(6.0 / (in_features + out_features))
    weight = jax.random.uniform(
        kw, (out_features, in_features), dtype=jnp.float32,
        minval=-bound, maxval=bound,
    )

    ref_loss, ref_cos = _reference(x, weight, label)

    # f32 MXU path (tight tolerance)
    loss32, cos32 = linear_loss(x, weight, label, compute_dtype=jnp.float32)
    jax.block_until_ready((loss32, cos32))
    assert jnp.allclose(loss32, ref_loss, atol=1e-4, rtol=1e-4)
    assert jnp.allclose(cos32, ref_cos, atol=1e-4, rtol=1e-4)

    # bf16 MXU path (default: bf16 operands, f32 accumulate + f32 softmax)
    loss16, cos16 = linear_loss(x, weight, label)
    jax.block_until_ready((loss16, cos16))
    assert jnp.allclose(loss16, ref_loss, atol=2e-2, rtol=2e-2)
    assert jnp.allclose(cos16, ref_cos, atol=2e-2, rtol=2e-2)

    print("KERNEL_OK")
</pallas_src>

<mosaic_0001>
module attributes {stable_mosaic.version = 11 : i64} {
  func.func @_linear_loss_kernel(%arg0: i32, %arg1: i32, %arg2: memref<8x32xf32, #tpu.memory_space<vmem>>, %arg3: memref<16x32xf32, #tpu.memory_space<vmem>>, %arg4: memref<8x1xi32, #tpu.memory_space<vmem>>, %arg5: memref<8x1xf32, #tpu.memory_space<vmem>>, %arg6: memref<8x16xf32, #tpu.memory_space<vmem>>, %arg7: memref<8x1xf32, #tpu.memory_space<vmem>>, %arg8: memref<8x1xf32, #tpu.memory_space<vmem>>, %arg9: memref<8x1xf32, #tpu.memory_space<vmem>>, %arg10: memref<8x1xf32, #tpu.memory_space<vmem>>) attributes {dimension_semantics = [#tpu.dimension_semantics<parallel>, #tpu.dimension_semantics<arbitrary>], iteration_bounds = array<i64: 1, 1>, scalar_prefetch = 0 : i64, scratch_operands = 4 : i64, tpu.core_type = #tpu.core_type<tc>, window_params = [{transform_indices = @transform_0, window_bounds = array<i64: 8, 32>}, {transform_indices = @transform_1, window_bounds = array<i64: 16, 32>}, {transform_indices = @transform_2, window_bounds = array<i64: 8, 1>}, {transform_indices = @transform_3, window_bounds = array<i64: 8, 1>}, {transform_indices = @transform_4, window_bounds = array<i64: 8, 16>}]} {
    %c0_i32 = arith.constant 0 : i32
    %0 = arith.cmpi eq, %arg1, %c0_i32 : i32
    %1 = arith.extui %0 : i1 to i32
    %c0_i32_0 = arith.constant 0 : i32
    %2 = arith.cmpi ne, %1, %c0_i32_0 : i32
    scf.if %2 {
      %cst_29 = arith.constant 0xFF800000 : f32
      %52 = vector.broadcast %cst_29 : f32 to vector<8x1xf32>
      %c0_30 = arith.constant 0 : index
      %c0_31 = arith.constant 0 : index
      %53 = vector.load %arg7[%c0_30, %c0_31] : memref<8x1xf32, #tpu.memory_space<vmem>>, vector<8x1xf32>
      tpu.vector_store %arg7[%c0_30, %c0_31], %52 {strides = array<i32>} : memref<8x1xf32, #tpu.memory_space<vmem>>, vector<8x1xf32>,
      %cst_32 = arith.constant 0.000000e+00 : f32
      %54 = vector.broadcast %cst_32 : f32 to vector<8x1xf32>
      %c0_33 = arith.constant 0 : index
      %c0_34 = arith.constant 0 : index
      %55 = vector.load %arg8[%c0_33, %c0_34] : memref<8x1xf32, #tpu.memory_space<vmem>>, vector<8x1xf32>
      tpu.vector_store %arg8[%c0_33, %c0_34], %54 {strides = array<i32>} : memref<8x1xf32, #tpu.memory_space<vmem>>, vector<8x1xf32>,
      %cst_35 = arith.constant 0.000000e+00 : f32
      %56 = vector.broadcast %cst_35 : f32 to vector<8x1xf32>
      %c0_36 = arith.constant 0 : index
      %c0_37 = arith.constant 0 : index
      %57 = vector.load %arg9[%c0_36, %c0_37] : memref<8x1xf32, #tpu.memory_space<vmem>>, vector<8x1xf32>
      tpu.vector_store %arg9[%c0_36, %c0_37], %56 {strides = array<i32>} : memref<8x1xf32, #tpu.memory_space<vmem>>, vector<8x1xf32>,
      %c0_38 = arith.constant 0 : index
      %c0_39 = arith.constant 0 : index
      %58 = vector.load %arg2[%c0_38, %c0_39] : memref<8x32xf32, #tpu.memory_space<vmem>>, vector<8x32xf32>
      %59 = arith.mulf %58, %58 : vector<8x32xf32>
      %cst_40 = arith.constant dense<0.000000e+00> : vector<8xf32>
      %60 = vector.multi_reduction <add>, %59, %cst_40 [1] : vector<8x32xf32> to vector<8xf32>
      %61 = vector.shape_cast %60 : vector<8xf32> to vector<8x1xf32>
      %cst_41 = arith.constant 1.000000e-24 : f32
      %62 = vector.broadcast %cst_41 : f32 to vector<8x1xf32>
      %63 = arith.maximumf %61, %62 : vector<8x1xf32>
      %64 = math.rsqrt %63 : vector<8x1xf32>
      %c0_42 = arith.constant 0 : index
      %c0_43 = arith.constant 0 : index
      %65 = vector.load %arg10[%c0_42, %c0_43] : memref<8x1xf32, #tpu.memory_space<vmem>>, vector<8x1xf32>
      tpu.vector_store %arg10[%c0_42, %c0_43], %64 {strides = array<i32>} : memref<8x1xf32, #tpu.memory_space<vmem>>, vector<8x1xf32>,
    } else {
    }
    %c0 = arith.constant 0 : index
    %c0_1 = arith.constant 0 : index
    %3 = vector.load %arg3[%c0, %c0_1] : memref<16x32xf32, #tpu.memory_space<vmem>>, vector<16x32xf32>
    %4 = arith.mulf %3, %3 : vector<16x32xf32>
    %cst = arith.constant dense<0.000000e+00> : vector<16xf32>
    %5 = vector.multi_reduction <add>, %4, %cst [1] : vector<16x32xf32> to vector<16xf32>
    %6 = vector.shape_cast %5 : vector<16xf32> to vector<16x1xf32>
    %cst_2 = arith.constant 1.000000e-24 : f32
    %7 = vector.broadcast %cst_2 : f32 to vector<16x1xf32>
    %8 = arith.maximumf %6, %7 : vector<16x1xf32>
    %9 = math.rsqrt %8 : vector<16x1xf32>
    %10 = vector.broadcast %9 : vector<16x1xf32> to vector<16x32xf32>
    %11 = arith.mulf %3, %10 : vector<16x32xf32>
    %c0_3 = arith.constant 0 : index
    %c0_4 = arith.constant 0 : index
    %12 = vector.load %arg2[%c0_3, %c0_4] : memref<8x32xf32, #tpu.memory_space<vmem>>, vector<8x32xf32>
    %cst_5 = arith.constant dense<0.000000e+00> : vector<8x16xf32>
    %13 = tpu.matmul %12, %11, %cst_5 {dimension_numbers = #tpu.dot_dimension_numbers<[1], [1], [0], [0], [0, 0, 1, 0], [], []>} : vector<8x32xf32>, vector<16x32xf32>, vector<8x16xf32> -> vector<8x16xf32>
    %c0_6 = arith.constant 0 : index
    %c0_7 = arith.constant 0 : index
    %14 = vector.load %arg10[%c0_6, %c0_7] : memref<8x1xf32, #tpu.memory_space<vmem>>, vector<8x1xf32>
    %15 = vector.broadcast %14 : vector<8x1xf32> to vector<8x16xf32>
    %16 = arith.mulf %13, %15 : vector<8x16xf32>
    %c0_8 = arith.constant 0 : index
    %c0_9 = arith.constant 0 : index
    %17 = vector.load %arg6[%c0_8, %c0_9] : memref<8x16xf32, #tpu.memory_space<vmem>>, vector<8x16xf32>
    tpu.vector_store %arg6[%c0_8, %c0_9], %16 {strides = array<i32>} : memref<8x16xf32, #tpu.memory_space<vmem>>, vector<8x16xf32>,
    %c16_i32 = arith.constant 16 : i32
    %18 = arith.muli %arg1, %c16_i32 : i32
    %19 = tpu.iota {dimensions = array<i32: 1>} : vector<8x16xi32>
    %20 = vector.broadcast %18 : i32 to vector<8x16xi32>
    %21 = arith.addi %20, %19 : vector<8x16xi32>
    %c0_10 = arith.constant 0 : index
    %c0_11 = arith.constant 0 : index
    %22 = vector.load %arg7[%c0_10, %c0_11] : memref<8x1xf32, #tpu.memory_space<vmem>>, vector<8x1xf32>
    %cst_12 = arith.constant dense<0xFF800000> : vector<8xf32>
    %23 = vector.multi_reduction <maximumf>, %16, %cst_12 [1] : vector<8x16xf32> to vector<8xf32>
    %24 = vector.shape_cast %23 : vector<8xf32> to vector<8x1xf32>
    %25 = arith.maximumf %22, %24 : vector<8x1xf32>
    %26 = arith.subf %22, %25 : vector<8x1xf32>
    %27 = math.exp %26 : vector<8x1xf32>
    %28 = vector.broadcast %25 : vector<8x1xf32> to vector<8x16xf32>
    %29 = arith.subf %16, %28 : vector<8x16xf32>
    %30 = math.exp %29 : vector<8x16xf32>
    %c0_13 = arith.constant 0 : index
    %c0_14 = arith.constant 0 : index
    %31 = vector.load %arg8[%c0_13, %c0_14] : memref<8x1xf32, #tpu.memory_space<vmem>>, vector<8x1xf32>
    %32 = arith.mulf %27, %31 : vector<8x1xf32>
    %cst_15 = arith.constant dense<0.000000e+00> : vector<8xf32>
    %33 = vector.multi_reduction <add>, %30, %cst_15 [1] : vector<8x16xf32> to vector<8xf32>
    %34 = vector.shape_cast %33 : vector<8xf32> to vector<8x1xf32>
    %35 = arith.addf %32, %34 : vector<8x1xf32>
    %c0_16 = arith.constant 0 : index
    %c0_17 = arith.constant 0 : index
    %36 = vector.load %arg8[%c0_16, %c0_17] : memref<8x1xf32, #tpu.memory_space<vmem>>, vector<8x1xf32>
    tpu.vector_store %arg8[%c0_16, %c0_17], %35 {strides = array<i32>} : memref<8x1xf32, #tpu.memory_space<vmem>>, vector<8x1xf32>,
    %c0_18 = arith.constant 0 : index
    %c0_19 = arith.constant 0 : index
    %37 = vector.load %arg7[%c0_18, %c0_19] : memref<8x1xf32, #tpu.memory_space<vmem>>, vector<8x1xf32>
    tpu.vector_store %arg7[%c0_18, %c0_19], %25 {strides = array<i32>} : memref<8x1xf32, #tpu.memory_space<vmem>>, vector<8x1xf32>,
    %c0_20 = arith.constant 0 : index
    %c0_21 = arith.constant 0 : index
    %38 = vector.load %arg4[%c0_20, %c0_21] : memref<8x1xi32, #tpu.memory_space<vmem>>, vector<8x1xi32>
    %39 = vector.broadcast %38 : vector<8x1xi32> to vector<8x16xi32>
    %40 = arith.cmpi eq, %21, %39 : vector<8x16xi32>
    %41 = arith.extui %40 : vector<8x16xi1> to vector<8x16xi32>
    %42 = arith.sitofp %41 : vector<8x16xi32> to vector<8x16xf32>
    %c0_22 = arith.constant 0 : index
    %c0_23 = arith.constant 0 : index
    %43 = vector.load %arg9[%c0_22, %c0_23] : memref<8x1xf32, #tpu.memory_space<vmem>>, vector<8x1xf32>
    %44 = arith.mulf %42, %16 : vector<8x16xf32>
    %cst_24 = arith.constant dense<0.000000e+00> : vector<8xf32>
    %45 = vector.multi_reduction <add>, %44, %cst_24 [1] : vector<8x16xf32> to vector<8xf32>
    %46 = vector.shape_cast %45 : vector<8xf32> to vector<8x1xf32>
    %47 = arith.addf %43, %46 : vector<8x1xf32>
    %c0_25 = arith.constant 0 : index
    %c0_26 = arith.constant 0 : index
    %48 = vector.load %arg9[%c0_25, %c0_26] : memref<8x1xf32, #tpu.memory_space<vmem>>, vector<8x1xf32>
    tpu.vector_store %arg9[%c0_25, %c0_26], %47 {strides = array<i32>} : memref<8x1xf32, #tpu.memory_space<vmem>>, vector<8x1xf32>,
    %c0_i32_27 = arith.constant 0 : i32
    %49 = arith.cmpi eq, %arg1, %c0_i32_27 : i32
    %50 = arith.extui %49 : i1 to i32
    %c0_i32_28 = arith.constant 0 : i32
    %51 = arith.cmpi ne, %50, %c0_i32_28 : i32
    scf.if %51 {
      %c0_29 = arith.constant 0 : index
      %c0_30 = arith.constant 0 : index
      %52 = vector.load %arg7[%c0_29, %c0_30] : memref<8x1xf32, #tpu.memory_space<vmem>>, vector<8x1xf32>
      %c0_31 = arith.constant 0 : index
      %c0_32 = arith.constant 0 : index
      %53 = vector.load %arg8[%c0_31, %c0_32] : memref<8x1xf32, #tpu.memory_space<vmem>>, vector<8x1xf32>
      %54 = math.log %53 : vector<8x1xf32>
      %55 = arith.addf %52, %54 : vector<8x1xf32>
      %c0_33 = arith.constant 0 : index
      %c0_34 = arith.constant 0 : index
      %56 = vector.load %arg9[%c0_33, %c0_34] : memref<8x1xf32, #tpu.memory_space<vmem>>, vector<8x1xf32>
      %57 = arith.subf %55, %56 : vector<8x1xf32>
      %c0_35 = arith.constant 0 : index
      %c0_36 = arith.constant 0 : index
      %58 = vector.load %arg5[%c0_35, %c0_36] : memref<8x1xf32, #tpu.memory_space<vmem>>, vector<8x1xf32>
      tpu.vector_store %arg5[%c0_35, %c0_36], %57 {strides = array<i32>} : memref<8x1xf32, #tpu.memory_space<vmem>>, vector<8x1xf32>,
    } else {
    }
    return
  }
  func.func @transform_0(%arg0: i32, %arg1: i32) -> (i32, i32) {
    %c0_i32 = arith.constant 0 : i32
    %c0_i32_0 = arith.constant 0 : i32
    return %arg0, %c0_i32 : i32, i32
  }
  func.func @transform_1(%arg0: i32, %arg1: i32) -> (i32, i32) {
    %c0_i32 = arith.constant 0 : i32
    %c0_i32_0 = arith.constant 0 : i32
    return %arg1, %c0_i32 : i32, i32
  }
  func.func @transform_2(%arg0: i32, %arg1: i32) -> (i32, i32) {
    %c0_i32 = arith.constant 0 : i32
    %c0_i32_0 = arith.constant 0 : i32
    return %arg0, %c0_i32 : i32, i32
  }
  func.func @transform_3(%arg0: i32, %arg1: i32) -> (i32, i32) {
    %c0_i32 = arith.constant 0 : i32
    %c0_i32_0 = arith.constant 0 : i32
    return %arg0, %c0_i32 : i32, i32
  }
  func.func @transform_4(%arg0: i32, %arg1: i32) -> (i32, i32) {
    %c0_i32 = arith.constant 0 : i32
    return %arg0, %arg1 : i32, i32
  }
}

</mosaic_0001>

<bundles_post_ra>
// kernel: tpu_custom_call.1
= control target key start
LH: loop header
LB: loop body
LE: loop exit
PB: predicated region body
PF: predicated region fallthrough
CT: control target
= control target key end

     0   :  { %10 = vsyncpa [#allocation7], 0  ;;  %s402_s0 = inlined_call_operand.vmem [shape: f32[8,32], index: 0, kind: input, shape index: {}]   ;;  %s403_s1 = inlined_call_operand.hbm [shape: f32[16,32], index: 1, kind: input, shape index: {}]   ;;  %s404_s2 = inlined_call_operand.vmem [shape: s32[8,1], index: 2, kind: input, shape index: {}]   ;;  %s405_s3 = inlined_call_operand.vmem [shape: f32[8,1], index: 3, kind: output, shape index: {0}]   ;;  %s406_s4 = inlined_call_operand.hbm [shape: f32[8,16], index: 4, kind: output, shape index: {1}]  }
   0x1   :  { %11 = vsyncpa [#allocation8], 0  ;;  %s317_s15 = smov [#allocation6]   ;;  %s269_s19 = scalar_lea.hbm %s403_s1, 256 }
   0x2   :  { %s19_s16 = sshll.u32 %s317_s15, 4  ;;  %p270_p0 = scmp.ne.s32.totalorder %s403_s1, %s269_s19  ;;  %s20_s16 = int_to_ptr.vmem [resolvable:$true] %s19_s16 }
   0x3   :  { %p273_p1 = scmp.lt.u32.totalorder %s269_s19, %s403_s1 }
   0x5   :  { %p275_p2 = pnand %p273_p1, %p270_p0 }
   0x7   :  { %278 = shalt.err (!%p275_p2)
}
   0x8   :  { %s279_s24 = scalar_lea.vmem %s20_s16, 256  ;;  %p284_p4 = scmp.lt.s32.totalorder %s20_s16, %s20_s16 }
   0x9   :  { %p280_p3 = scmp.ne.s32.totalorder %s20_s16, %s279_s24  ;;  %p285_p5 = scmp.lt.s32.totalorder %s279_s24, %s279_s24 }
   0xb   :  { %p286_p6 = por %p285_p5, %p284_p4 }
   0xd   :  { %p287_p7 = pnand %p286_p6, %p280_p3 }
   0xf   :  { %290 = shalt.err (!%p287_p7)
}
  0x10   :  { %s318_s25 = smov 128   ;;  %s319_s26 = smov 8  }
  0x11   :  { %25 = dma.hbm_to_vmem [thread:$0]  %s403_s1, 256, %s20_s16, [#allocation7], %s318_s25, %s318_s25, %s319_s26  }
  0x12   :  { %313 = dma.done.wait [#allocation7], 256  }
  0x13   :  { %314 = vsyncadd [#allocation7], 4294967040  ;;  %vm41_vm0 = vcmask 261120   ;;  %v48_v0 = vld [vmem:[#allocation6] sm:$0xff]  ;;  %v49_v1 = vld [vmem:[#allocation6 + $0x8] sm:$0xff]  ;;  %v320_v9 = vmov 0.0|0.0   ;;  %v155_v36 = vlaneseq }
  0x14   :  { %v39_v2 = vld [vmem:[%s402_s0] sm:$0xff]  ;;  %v50_v3 = vmul.f32 %v48_v0, %v48_v0  ;;  %v51_v4 = vmul.f32 %v49_v1, %v49_v1  ;;  %242 = vmatprep.subr.bf16.mxu0 %v320_v9  ;;  %vm35_vm1 = vcmask 7168   ;;  %v321_v10 = vmov 0.0   ;;  %vm244_vm3 = vmpackc.low %vm41_vm0, %vm41_vm0 }
  0x15   :  { %v40_v5 = vmul.f32 %v39_v2, %v39_v2  ;;  %37 = vst.msk [vmem:[#allocation3] sm:$0xff] %vm35_vm1, %v321_v10  ;;  %38 = vst.msk [vmem:[#allocation4] sm:$0xff] %vm35_vm1, %v321_v10  ;;  %vm322_vm2 = vmmov 0   ;;  %v323_v11 = vmov 0   ;;  %v184_v25 = vld [vmem:[%s404_s2] sm:$0xff]  ;;  %v324_v26 = vmov -inf  }
  0x16   :  { %v53_v6 = vsel %vm41_vm0, %v50_v3, 0.0  ;;  %v56_v8 = vsel %vm41_vm0, %v51_v4, 0.0  ;;  %239 = vmatprep.mubr.msk.f32.mxu0 %vm322_vm2, %v321_v10  ;;  %255 = vset.pattern.permute.xlu1 %v323_v11  ;;  %36 = vst.msk [vmem:[#allocation2] sm:$0xff] %vm35_vm1, %v324_v26  ;;  %vm152_vm4 = vcmask 130048   ;;  %v156_v37 = vand.u32 127, %v155_v36  ;;  %s325_s2 = smov [#allocation9]  }
  0x17   :  { %v42_v7 = vsel %vm41_vm0, %v40_v5, 0.0  ;;  %54 = vadd.xlane.f32.xlu0 %v53_v6  ;;  %s217_s5 = sshll.u32 %s325_s2, 4  ;;  %s218_s5 = int_to_ptr.vmem [resolvable:$true] %s217_s5 }
  0x18   :  { %43 = vadd.xlane.f32.xlu1 %v42_v7  ;;  %256 = vset.pattern.permute.xlu0 %v323_v11  ;;  %s291_s6 = scalar_lea.vmem %s218_s5, 128  ;;  %p296_p9 = scmp.lt.s32.totalorder %s218_s5, %s218_s5 }
  0x19   :  { %p292_p8 = scmp.ne.s32.totalorder %s218_s5, %s291_s6  ;;  %p297_p10 = scmp.lt.s32.totalorder %s291_s6, %s291_s6 }
  0x1b   :  { %57 = vadd.xlane.f32.xlu0 %v56_v8  ;;  %p298_p11 = por %p297_p10, %p296_p9 }
  0x1c   :  { %v191_v47 = vld [vmem:[#allocation4] sm:$0xff] }
  0x1d   :  { %v159_v32 = vld [vmem:[#allocation2] sm:$0xff]  ;;  %p299_p12 = pnand %p298_p11, %p292_p8 }
  0xa4   :  { %v55_v12 = vpop.xlane.xlu0 %54 }
  0xa5   :  { %v44_v13 = vpop.xlane.xlu1 %43  ;;  %v59_v14 = vmax.f32 %v55_v12, 1e-24 }
  0xa6   :  { %v45_v15 = vmax.f32 %v44_v13, 1e-24 }
  0xa8   :  { %v58_v16 = vpop.xlane.xlu0 %57  ;;  %257 = vrsqrt.f32 %v45_v15 }
  0xa9   :  { %259 = vrsqrt.f32 %v59_v14  ;;  %v60_v17 = vmax.f32 %v58_v16, 1e-24 }
  0xab   :  { %261 = vrsqrt.f32 %v60_v17 }
  0xb2   :  { %v258_v18 = vpop.eup %257 }
  0xb3   :  { %v260_v19 = vpop.eup %259  ;;  %47 = vst.msk [vmem:[#allocation5] sm:$0xff] %vm35_vm1, %v258_v18 }
  0xb4   :  { %v63_v21 = vmul.f32 %v260_v19, %v48_v0 }
  0xb5   :  { %v262_v20 = vpop.eup %261 }
  0xb6   :  { %v64_v22 = vmul.f32 %v262_v20, %v49_v1 }
  0xb8   :  { %v243_v23 = vpack.c.bf16 %v64_v22, %v63_v21 }
  0xba   :  { %245 = vmatpush3.bf16.xpose.msk.msra.mxu0 %vm244_vm3, %v243_v23  ;;  %v145_v24 = vld [vmem:[#allocation5] sm:$0xff] }
  0xbb   :  { %148 = vperm.xlu1 %255, %v145_v24  }
  0xbf   :  { %186 = vperm.xlu1 %255, %v184_v25  }
  0xc1   :  { %240 = vmatmul.mubr.msk.f32.vlgmr.msra.gmra.mrb[0].mxu0 %vm41_vm0, %v39_v2 }
 0x13a   :  { %v149_v27 = vpop.permute.xlu1 %148 }
 0x13e   :  { %v187_v38 = vpop.permute.xlu1 %186 }
 0x13f   :  { %vm188_vm5 = vcmp.eq.s32.totalorder %v156_v37, %v187_v38 }
 0x140   :  { %v231_v39 = vsel %vm188_vm5, 1.0, %v321_v10 }
 0x194   :  { %v141_v28 = vpop.f32.mrb[0].mxu0 }
 0x195   :  { %v151_v29 = vmul.f32 %v149_v27, %v141_v28  ;;  %v241_v30 = vpop.f32.mrb[1].mxu0 }
 0x197   :  { %v160_v31 = vsel %vm152_vm4, %v151_v29, -inf  ;;  %153 = vst.msk [vmem:[#allocation9] sm:$0xff] %vm152_vm4, %v151_v29  ;;  %v192_v40 = vmul.f32 %v231_v39, %v151_v29 }
 0x198   :  { %161 = vmax.xlane.f32.xlu0 %v160_v31 }
 0x199   :  { %v193_v41 = vsel %vm152_vm4, %v192_v40, 0.0 }
 0x225   :  { %v162_v33 = vpop.xlane.xlu0 %161 }
 0x226   :  { %v163_v34 = vmax.f32 %v159_v32, %v162_v33 }
 0x228   :  { %v164_v35 = vsub.f32 %v159_v32, %v163_v34  ;;  %183 = vst.msk [vmem:[#allocation2] sm:$0xff] %vm35_vm1, %v163_v34  ;;  %169 = vperm.xlu0 %256, %v163_v34  }
 0x247   :  { %194 = vadd.xlane.f32.xlu0 %v193_v41 }
 0x2a7   :  { %v170_v42 = vpop.permute.xlu0 %169 }
 0x2a8   :  { %v172_v43 = vsub.f32 %v151_v29, %v170_v42 }
 0x2aa   :  { %v173_v44 = vmul.f32 1.442695, %v172_v43 }
 0x2ac   :  { %263 = vpow2.f32 %v173_v44 }
 0x2b6   :  { %v264_v45 = vpop.eup %263 }
 0x2b7   :  { %v177_v46 = vsel %vm152_vm4, %v264_v45, 0.0 }
 0x2b8   :  { %178 = vadd.xlane.f32.xlu1 %v177_v46 }
 0x2d4   :  { %v195_v48 = vpop.xlane.xlu0 %194 }
 0x2d5   :  { %v196_v49 = vadd.f32 %v195_v48, %v191_v47 }
 0x2d7   :  { %197 = vst.msk [vmem:[#allocation4] sm:$0xff] %vm35_vm1, %v196_v49 }
 0x2d8   :  { %302 = shalt.err (!%p299_p12)
}
 0x2d9   :  { %s303_s9 = scalar_lea.hbm %s406_s4, 128 }
 0x2da   :  { %p304_p13 = scmp.ne.s32.totalorder %s406_s4, %s303_s9  ;;  %p307_p0 = scmp.lt.u32.totalorder %s303_s9, %s406_s4 }
 0x2dc   :  { %p309_p1 = pnand %p307_p0, %p304_p13 }
 0x2de   :  { %312 = shalt.err (!%p309_p1)
}
 0x2df   :  { %220 = dma.vmem_to_hbm [thread:$0]  %s218_s5, 128, %s406_s4, [#allocation8]   ;;  %v165_v50 = vmul.f32 1.442695, %v164_v35  ;;  %v175_v52 = vld [vmem:[#allocation3] sm:$0xff]  ;;  %v201_v59 = vld [vmem:[#allocation2] sm:$0xff] }
 0x2e0   :  { %v206_v61 = vld [vmem:[#allocation4] sm:$0xff] }
 0x2e1   :  { %265 = vpow2.f32 %v165_v50 }
 0x2eb   :  { %v266_v51 = vpop.eup %265 }
 0x2ec   :  { %v176_v53 = vmul.f32 %v266_v51, %v175_v52 }
 0x345   :  { %v179_v54 = vpop.xlane.xlu1 %178 }
 0x346   :  { %v180_v55 = vadd.f32 %v179_v54, %v176_v53 }
 0x348   :  { %182 = vst.msk [vmem:[#allocation3] sm:$0xff] %vm35_vm1, %v180_v55 }
 0x34f   :  { %v202_v56 = vld [vmem:[#allocation3] sm:$0xff] }
 0x350   :  { %267 = vlog2.f32 %v202_v56 }
 0x35a   :  { %v268_v57 = vpop.eup %267 }
 0x35b   :  { %v204_v58 = vmul.f32 0.6931472, %v268_v57 }
 0x35d   :  { %v205_v60 = vadd.f32 %v204_v58, %v201_v59 }
 0x35f   :  { %v207_v62 = vsub.f32 %v205_v60, %v206_v61 }
 0x361   :  { %208 = vst.msk [vmem:[%s405_s3] sm:$0xff] %vm35_vm1, %v207_v62 }
 0x362   :  { %315 = dma.done.wait [#allocation8], 128  }
 0x363   :  { %316 = vsyncadd [#allocation8], 4294967168 }
 0x364   :  { %226 = vsyncpa [#allocation7], 1 }
 0x365   :  { %227 = vsyncpa [#allocation8], 1 }

</bundles_post_ra>
